<compile_context>
chip_gen: v5e
topology: v5e:2x2
jax: 0.10.0
libtpu: 0.0.40
codegen_flags: <defaults>
</compile_context>

<pallas_src>
import jax
import jax.numpy as jnp
from jax.experimental import pallas as pl
from jax.experimental.pallas import tpu as pltpu


def _param_sigmoid_kernel(alpha_ref, x_ref, o_ref):
    # alpha_ref: (1,) f32 scalar in SMEM.  x_ref / o_ref: (tm, LANE) VMEM tiles.
    alpha = alpha_ref[0]
    x = x_ref[...].astype(jnp.float32)
    # exp goes to the EUP slot; add/div on the VPU.  Exact divide keeps the
    # forward semantics identical to the PyTorch module (1 / (1 + exp(-a*x))).
    y = 1.0 / (1.0 + jnp.exp(-alpha * x))
    o_ref[...] = y.astype(o_ref.dtype)


def param_sigmoid(x: jax.Array, alpha: jax.Array) -> jax.Array:
    """Parametric sigmoid matching the PyTorch module's forward exactly.

    x:     any-shaped float array (NCHW in the reference usage).
    alpha: scalar learnable parameter (0-d / 1-element array, kept in f32).
    """
    orig_shape = x.shape
    dtype = x.dtype
    n = x.size

    LANE = 512                                   # lane-dense: multiple of 128
    itemsize = jnp.dtype(dtype).itemsize
    SUB = 8 * max(1, 4 // itemsize)              # sublane multiple: f32->8, bf16->16
    TM_MAX = 1024                                # 1024x512 f32 = 2 MiB per block

    # Flatten and pad to a lane-dense (rows, LANE) slab whose rows divide evenly
    # into the chosen tile height.
    rows = -(-n // LANE)
    if rows <= TM_MAX:
        tm = -(-rows // SUB) * SUB               # single grid step, sublane-aligned
        rows_padded = tm
    else:
        tm = TM_MAX                              # already a multiple of SUB
        rows_padded = -(-rows // tm) * tm

    padded_n = rows_padded * LANE
    flat = x.reshape(-1)
    if padded_n != n:
        flat = jnp.pad(flat, (0, padded_n - n))
    x2d = flat.reshape(rows_padded, LANE)

    grid = (rows_padded // tm,)

    # Keep the learnable parameter in f32 (don't round it to a bf16 activation dtype).
    alpha_smem = jnp.asarray(alpha, dtype=jnp.float32).reshape((1,))

    out2d = pl.pallas_call(
        _param_sigmoid_kernel,
        out_shape=jax.ShapeDtypeStruct((rows_padded, LANE), dtype),
        grid=grid,
        in_specs=[
            pl.BlockSpec(memory_space=pltpu.SMEM),            # alpha scalar
            pl.BlockSpec((tm, LANE), lambda i: (i, 0)),        # lane-dense x tile
        ],
        out_specs=pl.BlockSpec((tm, LANE), lambda i: (i, 0)),
        compiler_params=pltpu.CompilerParams(
            dimension_semantics=("parallel",),                 # megacore sharding on v7x
        ),
    )(alpha_smem, x2d)

    return out2d.reshape(-1)[:n].reshape(orig_shape)


if __name__ == "__main__":
    key = jax.random.PRNGKey(0)
    # Small NCHW input consistent with typical conv-activation usage.
    x = jax.random.normal(key, (2, 4, 16, 16), dtype=jnp.float32)

    # Default module parameter alpha = 1.0 (scalar, f32).
    alpha = jnp.array(1.0, dtype=jnp.float32)

    y = param_sigmoid(x, alpha)
    y = jax.block_until_ready(y)

    # Reference check in plain JAX.
    y_ref = 1.0 / (1.0 + jnp.exp(-alpha * x))
    assert y.shape == x.shape and y.dtype == x.dtype
    assert jnp.allclose(y, y_ref, atol=1e-6, rtol=1e-6)

    print("KERNEL_OK")
</pallas_src>

<mosaic_0001>
module attributes {stable_mosaic.version = 11 : i64} {
  func.func @_param_sigmoid_kernel(%arg0: i32, %arg1: memref<1xf32, #tpu.memory_space<smem>>, %arg2: memref<8x512xf32, #tpu.memory_space<vmem>>, %arg3: memref<8x512xf32, #tpu.memory_space<vmem>>) attributes {dimension_semantics = [#tpu.dimension_semantics<parallel>], iteration_bounds = array<i64: 1>, scalar_prefetch = 0 : i64, scratch_operands = 0 : i64, tpu.core_type = #tpu.core_type<tc>, window_params = [{transform_indices = @transform_0, window_bounds = array<i64: 1>}, {transform_indices = @transform_1, window_bounds = array<i64: 8, 512>}, {transform_indices = @transform_2, window_bounds = array<i64: 8, 512>}]} {
    %c0 = arith.constant 0 : index
    %0 = memref.load %arg1[%c0] : memref<1xf32, #tpu.memory_space<smem>>
    %c0_0 = arith.constant 0 : index
    %c0_1 = arith.constant 0 : index
    %1 = vector.load %arg2[%c0_0, %c0_1] : memref<8x512xf32, #tpu.memory_space<vmem>>, vector<8x512xf32>
    %cst = arith.constant 0.000000e+00 : f32
    %2 = arith.subf %cst, %0 : f32
    %3 = vector.broadcast %2 : f32 to vector<8x512xf32>
    %4 = arith.mulf %3, %1 : vector<8x512xf32>
    %5 = math.exp %4 : vector<8x512xf32>
    %cst_2 = arith.constant 1.000000e+00 : f32
    %6 = vector.broadcast %cst_2 : f32 to vector<8x512xf32>
    %7 = arith.addf %6, %5 : vector<8x512xf32>
    %cst_3 = arith.constant 1.000000e+00 : f32
    %8 = vector.broadcast %cst_3 : f32 to vector<8x512xf32>
    %9 = arith.divf %8, %7 : vector<8x512xf32>
    %c0_4 = arith.constant 0 : index
    %c0_5 = arith.constant 0 : index
    %10 = vector.load %arg3[%c0_4, %c0_5] : memref<8x512xf32, #tpu.memory_space<vmem>>, vector<8x512xf32>
    tpu.vector_store %arg3[%c0_4, %c0_5], %9 {strides = array<i32>} : memref<8x512xf32, #tpu.memory_space<vmem>>, vector<8x512xf32>,
    return
  }
  func.func @transform_0(%arg0: i32) -> i32 {
    %c0_i32 = arith.constant 0 : i32
    %c0_i32_0 = arith.constant 0 : i32
    return %c0_i32 : i32
  }
  func.func @transform_1(%arg0: i32) -> (i32, i32) {
    %c0_i32 = arith.constant 0 : i32
    %c0_i32_0 = arith.constant 0 : i32
    return %arg0, %c0_i32 : i32, i32
  }
  func.func @transform_2(%arg0: i32) -> (i32, i32) {
    %c0_i32 = arith.constant 0 : i32
    %c0_i32_0 = arith.constant 0 : i32
    return %arg0, %c0_i32 : i32, i32
  }
}

</mosaic_0001>

<bundles_post_ra>
// kernel: tpu_custom_call.1
= control target key start
LH: loop header
LB: loop body
LE: loop exit
PB: predicated region body
PF: predicated region fallthrough
CT: control target
= control target key end

     0   :  { %8 = vsyncpa [#allocation4], 0  ;;  %s261_s0 = inlined_call_operand.<no memory space> [shape: f32[1], index: 0, kind: input, shape index: {}]   ;;  %s262_s1 = inlined_call_operand.hbm [shape: f32[8,512], index: 1, kind: input, shape index: {}]   ;;  %s263_s2 = inlined_call_operand.hbm [shape: f32[8,512], index: 2, kind: output, shape index: {}]  }
   0x1   :  { %9 = vsyncpa [#allocation5], 0  ;;  %s17_s11 = sshll.u32 %s262_s1, 4  ;;  %s201_s12 = smov [#allocation3]   ;;  %s18_s11 = int_to_ptr.hbm [resolvable:$true] %s17_s11 }
   0x2   :  { %s19_s13 = sshll.u32 %s201_s12, 4  ;;  %s20_s13 = int_to_ptr.vmem [resolvable:$true] %s19_s13 }
   0x3   :  { %22 = dma.hbm_to_vmem [thread:$0]  %s18_s11, 512, %s20_s13, [#allocation4]  }
   0x4   :  { %197 = dma.done.wait [#allocation4], 512  }
   0x5   :  { %198 = vsyncadd [#allocation4], 4294966784  ;;  %s32_s16 = ssub.f32 0.0, %s261_s0  ;;  %v28_v1 = vld [vmem:[#allocation3] sm:$0xff]  ;;  %v29_v2 = vld [vmem:[#allocation3 + $0x8] sm:$0xff]  ;;  %s202_s0 = smov [#allocation6]  }
   0x6   :  { %v30_v3 = vld [vmem:[#allocation3 + $0x10] sm:$0xff]  ;;  %v31_v7 = vld [vmem:[#allocation3 + $0x18] sm:$0xff]  ;;  %s119_s1 = sshll.u32 %s202_s0, 4  ;;  %s121_s19 = sshll.u32 %s263_s2, 4  ;;  %s120_s1 = int_to_ptr.vmem [resolvable:$true] %s119_s1  ;;  %s122_s19 = int_to_ptr.hbm [resolvable:$true] %s121_s19 }
   0x7   :  { %v33_v0 = vstv %s32_s16 }
   0x8   :  { %v34_v4 = vmul.f32 %v33_v0, %v28_v1  ;;  %v35_v5 = vmul.f32 %v33_v0, %v29_v2  ;;  %v36_v6 = vmul.f32 %v33_v0, %v30_v3  ;;  %v37_v8 = vmul.f32 %v33_v0, %v31_v7 }
   0xa   :  { %v38_v9 = vmul.f32 1.442695, %v34_v4  ;;  %v40_v10 = vmul.f32 1.442695, %v35_v5  ;;  %v42_v11 = vmul.f32 1.442695, %v36_v6 }
   0xb   :  { %v44_v12 = vmul.f32 1.442695, %v37_v8 }
   0xc   :  { %133 = vpow2.f32 %v38_v9 }
   0xd   :  { %135 = vpow2.f32 %v40_v10 }
   0xe   :  { %137 = vpow2.f32 %v42_v11 }
   0xf   :  { %139 = vpow2.f32 %v44_v12 }
  0x12   :  { %v134_v13 = vpop.eup %133 }
  0x13   :  { %v136_v14 = vpop.eup %135  ;;  %v46_v15 = vadd.f32 1.0, %v134_v13 }
  0x14   :  { %v138_v16 = vpop.eup %137  ;;  %v47_v17 = vadd.f32 1.0, %v136_v14 }
  0x15   :  { %v140_v18 = vpop.eup %139  ;;  %141 = vrcp.f32 %v46_v15  ;;  %v48_v19 = vadd.f32 1.0, %v138_v16  ;;  %v59_v21 = vand.u32 2147483647, %v46_v15  ;;  %v61_v22 = vand.u32 2147483648, %v46_v15 }
  0x16   :  { %143 = vrcp.f32 %v47_v17  ;;  %v49_v20 = vadd.f32 1.0, %v140_v18  ;;  %v74_v24 = vand.u32 2147483647, %v47_v17  ;;  %v76_v25 = vand.u32 2147483648, %v47_v17 }
  0x17   :  { %145 = vrcp.f32 %v48_v19  ;;  %vm55_vm0 = vweird.f32 %v46_v15  ;;  %vm70_vm1 = vweird.f32 %v47_v17  ;;  %vm224_vm3 = vcmp.eq.f32.partialorder %v59_v21, 8.507059e+37 }
  0x18   :  { %147 = vrcp.f32 %v49_v20  ;;  %v62_v31 = vor.u32 1.1754944e-38, %v61_v22  ;;  %vm228_vm5 = vcmp.eq.f32.partialorder %v74_v24, 8.507059e+37  ;;  %v77_v35 = vor.u32 1.1754944e-38, %v76_v25 }
  0x19   :  { %vm85_vm6 = vweird.f32 %v48_v19  ;;  %v89_v39 = vand.u32 2147483647, %v48_v19  ;;  %v91_v42 = vand.u32 2147483648, %v48_v19  ;;  %vm100_vm8 = vweird.f32 %v49_v20 }
  0x1a   :  { %v106_v47 = vand.u32 2147483648, %v49_v20  ;;  %v104_v50 = vand.u32 2147483647, %v49_v20 }
  0x1b   :  { %v142_v23 = vpop.eup %141  ;;  %v92_v56 = vor.u32 1.1754944e-38, %v91_v42  ;;  %vm90_vm13 = vcmp.eq.f32.partialorder %v89_v39, 8.507059e+37 }
  0x1c   :  { %v144_v26 = vpop.eup %143  ;;  %v51_v27 = vmul.f32 %v142_v23, %v46_v15  ;;  %vm56_vm2 = vweird.f32 %v142_v23  ;;  %v107_v60 = vor.u32 1.1754944e-38, %v106_v47  ;;  %vm105_vm15 = vcmp.eq.f32.partialorder %v104_v50, 8.507059e+37 }
  0x1d   :  { %v66_v28 = vmul.f32 %v144_v26, %v47_v17  ;;  %v146_v32 = vpop.eup %145  ;;  %vm71_vm4 = vweird.f32 %v144_v26  ;;  %vm233_vm7 = vmor %vm55_vm0, %vm56_vm2 }
  0x1e   :  { %v52_v29 = vsub.f32 1.0, %v51_v27  ;;  %v148_v36 = vpop.eup %147  ;;  %v81_v38 = vmul.f32 %v146_v32, %v48_v19  ;;  %vm238_vm9 = vmor %vm70_vm1, %vm71_vm4  ;;  %vm86_vm10 = vweird.f32 %v146_v32 }
  0x1f   :  { %v67_v33 = vsub.f32 1.0, %v66_v28  ;;  %v96_v43 = vmul.f32 %v148_v36, %v49_v20  ;;  %vm101_vm11 = vweird.f32 %v148_v36  ;;  %vm249_vm12 = vmor %vm85_vm6, %vm86_vm10 }
  0x20   :  { %v53_v37 = vmul.f32 %v142_v23, %v52_v29  ;;  %v82_v46 = vsub.f32 1.0, %v81_v38  ;;  %vm102_vm14 = vmor %vm100_vm8, %vm101_vm11 }
  0x21   :  { %v68_v41 = vmul.f32 %v144_v26, %v67_v33  ;;  %v97_v49 = vsub.f32 1.0, %v96_v43 }
  0x22   :  { %v54_v44 = vadd.f32 %v142_v23, %v53_v37  ;;  %v83_v52 = vmul.f32 %v146_v32, %v82_v46 }
  0x23   :  { %v69_v48 = vadd.f32 %v144_v26, %v68_v41  ;;  %v98_v57 = vmul.f32 %v148_v36, %v97_v49 }
  0x24   :  { %v58_v51 = vsel %vm233_vm7, %v142_v23, %v54_v44  ;;  %v84_v59 = vadd.f32 %v146_v32, %v83_v52 }
  0x25   :  { %v63_v53 = vsel %vm224_vm3, %v62_v31, %v58_v51  ;;  %v73_v54 = vsel %vm238_vm9, %v144_v26, %v69_v48  ;;  %v99_v61 = vadd.f32 %v148_v36, %v98_v57 }
  0x26   :  { %110 = vst [vmem:[#allocation6] sm:$0xff] %v63_v53  ;;  %v78_v58 = vsel %vm228_vm5, %v77_v35, %v73_v54  ;;  %v88_v62 = vsel %vm249_vm12, %v146_v32, %v84_v59 }
  0x27   :  { %111 = vst [vmem:[#allocation6 + $0x8] sm:$0xff] %v78_v58  ;;  %v93_v63 = vsel %vm90_vm13, %v92_v56, %v88_v62  ;;  %v103_v0 = vsel %vm102_vm14, %v148_v36, %v99_v61 }
  0x28   :  { %112 = vst [vmem:[#allocation6 + $0x10] sm:$0xff] %v93_v63  ;;  %v108_v1 = vsel %vm105_vm15, %v107_v60, %v103_v0 }
  0x29   :  { %113 = vst [vmem:[#allocation6 + $0x18] sm:$0xff] %v108_v1 }
  0x2a   :  { %124 = dma.vmem_to_hbm [thread:$0]  %s120_s1, 512, %s122_s19, [#allocation5]  }
  0x2b   :  { %199 = dma.done.wait [#allocation5], 512  }
  0x2c   :  { %200 = vsyncadd [#allocation5], 4294966784 }
  0x2d   :  { %129 = vsyncpa [#allocation4], 1 }
  0x2e   :  { %130 = vsyncpa [#allocation5], 1 }

</bundles_post_ra>
